<compile_context>
chip_gen: v7x
topology: tpu7x:2x2x1
jax: 0.10.0
libtpu: 0.0.40
codegen_flags: <defaults>
</compile_context>

<pallas_src>
import math

import jax
import jax.numpy as jnp
from jax.experimental import pallas as pl
from jax.experimental.pallas import tpu as pltpu


# ---------------------------------------------------------------------------
# Fused dual-head 1x1-conv Pallas kernel
# ---------------------------------------------------------------------------
def _fused_head_kernel(xc_ref, xr_ref, wct_ref, wrt_ref, b_ref, o_ref):
    # xc_ref : (cls_dim, tn)  cls activations, channel-major (NCHW) spatial tile
    # xr_ref : (reg_dim, tn)  reg activations, channel-major spatial tile
    # wct_ref: (P, cls_dim)   cls weight, pre-transposed + zero-padded into slab
    # wrt_ref: (P, reg_dim)   reg weight, pre-transposed + zero-padded into slab
    # b_ref  : (1, P)         packed bias (cls | reg | zeros), f32
    # o_ref  : (tn, P)        packed, lane-dense output slab
    #
    # Standard (lhs last-dim x rhs first-dim) contractions -> no hidden
    # activation transpose.  Accumulate in f32 on the MXU.
    acc = jnp.dot(wct_ref[...], xc_ref[...],
                  preferred_element_type=jnp.float32)          # (P, tn)
    acc = acc + jnp.dot(wrt_ref[...], xr_ref[...],
                        preferred_element_type=jnp.float32)    # (P, tn)
    # One small XLU transpose of the result (128 x tn), then bias + cast + store.
    o_ref[...] = (acc.T + b_ref[...]).astype(o_ref.dtype)


def _round_up(x, m):
    return ((x + m - 1) // m) * m


def fused_det_head(xc, xr, wct, wrt, bias, *, tile_rows=1024,
                   out_dtype=jnp.bfloat16):
    """Fused cls+reg 1x1 conv heads.

    xc  : (B, cls_dim, HW)  -- NCHW activations with H,W collapsed (free reshape)
    xr  : (B, reg_dim, HW)
    wct : (P, cls_dim), wrt: (P, reg_dim)  -- pre-transposed packed weights
    bias: (1, P) f32                        -- packed bias (cls | reg | zeros)
    Returns the packed (B, HW, P) output slab (cls cols first, then reg cols).
    """
    assert tile_rows % 128 == 0, "tile_rows must be a multiple of 128"
    B, cls_dim, hw = xc.shape
    _, reg_dim, hw_r = xr.shape
    assert hw_r == hw, "cls_feat and reg_feat must share spatial size"
    P, cls_dim_w = wct.shape
    assert cls_dim_w == cls_dim and wrt.shape == (P, reg_dim)
    assert P % 128 == 0, "packed slab width must be lane-aligned"

    # ---- spatial tile selection (no padding: ragged tail is edge-clipped) ----
    if hw > tile_rows:
        tn = tile_rows
    else:
        # Single-tile path: MXU-align to 256 rows (v6e/v7x 2x256x256 MXUs).
        tn = _round_up(hw, 256)
        if B * pl.cdiv(hw, tn) < 2 and hw > 256:
            # Guarantee >=2 grid programs so both v7x TensorCores get work.
            tn = _round_up((hw + 1) // 2, 128)
    n_tiles = pl.cdiv(hw, tn)

    cost = pl.CostEstimate(
        flops=2 * B * n_tiles * tn * (cls_dim + reg_dim) * P,
        transcendentals=0,
        bytes_accessed=int(
            xc.size * jnp.dtype(xc.dtype).itemsize
            + xr.size * jnp.dtype(xr.dtype).itemsize
            + wct.size * jnp.dtype(wct.dtype).itemsize
            + wrt.size * jnp.dtype(wrt.dtype).itemsize
            + bias.size * jnp.dtype(bias.dtype).itemsize
            + B * hw * P * jnp.dtype(out_dtype).itemsize),
    )

    packed = pl.pallas_call(
        _fused_head_kernel,
        out_shape=jax.ShapeDtypeStruct((B, hw, P), out_dtype),
        grid_spec=pltpu.PrefetchScalarGridSpec(
            num_scalar_prefetch=0,
            grid=(B, n_tiles),
            in_specs=[
                pl.BlockSpec((None, cls_dim, tn), lambda b, j: (b, 0, j)),
                pl.BlockSpec((None, reg_dim, tn), lambda b, j: (b, 0, j)),
                pl.BlockSpec((P, cls_dim), lambda b, j: (0, 0)),
                pl.BlockSpec((P, reg_dim), lambda b, j: (0, 0)),
                pl.BlockSpec((1, P), lambda b, j: (0, 0)),
            ],
            out_specs=pl.BlockSpec((None, tn, P), lambda b, j: (b, j, 0)),
        ),
        compiler_params=pltpu.CompilerParams(
            dimension_semantics=("parallel", "parallel")),
        cost_estimate=cost,
    )(xc, xr, wct, wrt, bias)

    return packed


# ---------------------------------------------------------------------------
# Module wrapper
# ---------------------------------------------------------------------------
class DetPredLayer:
    def __init__(self, cls_dim=256, reg_dim=256, stride=32, reg_max=16,
                 num_classes=80, num_coords=4, *, tile_rows=1024,
                 compute_dtype=jnp.bfloat16, out_dtype=jnp.bfloat16, key=None):
        self.stride = stride
        self.cls_dim = cls_dim
        self.reg_dim = reg_dim
        self.reg_max = reg_max
        self.num_classes = num_classes
        self.num_coords = num_coords
        self.tile_rows = tile_rows
        self.compute_dtype = compute_dtype
        self.out_dtype = out_dtype

        if key is None:
            key = jax.random.PRNGKey(0)
        # cls_pred weight: uniform(-1/sqrt(fan_in), 1/sqrt(fan_in))  (f32 master copy)
        bound = 1.0 / math.sqrt(cls_dim)
        self.cls_w = jax.random.uniform(
            key, (cls_dim, num_classes), minval=-bound, maxval=bound,
            dtype=jnp.float32)
        # init_bias(): cls bias = focal-style prior
        self.cls_b = jnp.full(
            (num_classes,),
            math.log(5 / num_classes / (640.0 / stride) ** 2),
            dtype=jnp.float32)
        # init_bias(): reg weight zeroed, reg bias filled with 1.0
        self.reg_w = jnp.zeros((reg_dim, num_coords), dtype=jnp.float32)
        self.reg_b = jnp.ones((num_coords,), dtype=jnp.float32)

        # Pack both heads into one lane-dense >=128-wide output slab:
        #   cols [0, num_classes)                -> cls head
        #   cols [num_classes, num_classes+nc)   -> reg head
        #   remaining cols                       -> zero (never read)
        # Weights are pre-transposed to (P, Cin) so the kernel contracts the
        # last dim of W^T against the first dim of the channel-major activation
        # tile (standard MXU matmul, no hidden activation transpose), and cast
        # to the bf16 compute dtype (accumulation stays f32 in-kernel).
        ctot = num_classes + num_coords
        P = max(128, ((ctot + 127) // 128) * 128)
        self.packed_width = P
        self.wct_packed = (jnp.zeros((P, cls_dim), jnp.float32)
                           .at[:num_classes, :].set(self.cls_w.T)
                           ).astype(compute_dtype)
        self.wrt_packed = (jnp.zeros((P, reg_dim), jnp.float32)
                           .at[num_classes:ctot, :].set(self.reg_w.T)
                           ).astype(compute_dtype)
        self.b_packed = (jnp.zeros((1, P), jnp.float32)
                         .at[0, :num_classes].set(self.cls_b)
                         .at[0, num_classes:ctot].set(self.reg_b))

    def generate_anchors(self, fmp_size):
        # Static-shape constant: plain JAX so XLA constant-folds it.
        H, W = fmp_size
        ay, ax = jnp.meshgrid(jnp.arange(H, dtype=jnp.float32),
                              jnp.arange(W, dtype=jnp.float32), indexing="ij")
        anchors = jnp.stack([ax, ay], axis=-1).reshape(-1, 2)
        return (anchors + 0.5) * float(self.stride)

    def __call__(self, cls_feat, reg_feat):
        B, _, H, W = cls_feat.shape
        hw = H * W
        # Free reshapes (collapse trailing contiguous dims) -- no transpose pass.
        # bf16 cast halves HBM read traffic of this memory-bound kernel.
        xc = cls_feat.reshape(B, self.cls_dim, hw).astype(self.compute_dtype)
        xr = reg_feat.reshape(B, self.reg_dim, hw).astype(self.compute_dtype)

        packed = fused_det_head(xc, xr, self.wct_packed, self.wrt_packed,
                                self.b_packed, tile_rows=self.tile_rows,
                                out_dtype=self.out_dtype)              # (B, HW, P)

        nc = self.num_classes
        cls_pred = packed[:, :, :nc]                                   # (B, HW, num_classes)
        reg_pred = packed[:, :, nc:nc + self.num_coords]               # (B, HW, num_coords)
        reg_pred = reg_pred.reshape(B, -1, 4 * self.reg_max)           # torch .view(B,-1,4*reg_max)

        anchors = self.generate_anchors([H, W])                        # (HW, 2)
        stride_tensor = jnp.ones_like(anchors[..., :1]) * self.stride  # (HW, 1)
        return {
            'pred_cls': cls_pred,
            'pred_reg': reg_pred,
            'anchors': anchors,
            'strides': self.stride,
            'stride_tensor': stride_tensor,
        }


# ---------------------------------------------------------------------------
# Demo / correctness check
# ---------------------------------------------------------------------------
if __name__ == "__main__":
    # H*W = 400 is NOT a multiple of the spatial tile -> exercises the
    # pad-free ragged-edge (clipped final block) path.
    B, C, H, W = 2, 128, 20, 20
    num_classes, reg_max, num_coords, stride = 16, 4, 4, 32
    hw = H * W

    key = jax.random.PRNGKey(0)
    k_cls, k_reg, k_param = jax.random.split(key, 3)
    cls_feat = jax.random.normal(k_cls, (B, C, H, W), dtype=jnp.float32)
    reg_feat = jax.random.normal(k_reg, (B, C, H, W), dtype=jnp.float32)

    layer = DetPredLayer(cls_dim=C, reg_dim=C, stride=stride, reg_max=reg_max,
                         num_classes=num_classes, num_coords=num_coords,
                         key=k_param)

    out = layer(cls_feat, reg_feat)
    jax.block_until_ready(out)

    # --- pure-JAX reference (same bf16-rounded inputs/weights, f32 accumulate) ---
    xc_b = cls_feat.astype(jnp.bfloat16).astype(jnp.float32).reshape(B, C, hw)
    w_b = layer.cls_w.astype(jnp.bfloat16).astype(jnp.float32)
    cls_ref = jnp.einsum('bcn,co->bno', xc_b, w_b) + layer.cls_b
    reg_ref = jnp.full((B, (hw * num_coords) // (4 * reg_max), 4 * reg_max),
                       1.0, dtype=jnp.float32)   # reg weight is 0, bias is 1
    ay, ax = jnp.meshgrid(jnp.arange(H), jnp.arange(W), indexing='ij')
    anchors_ref = (jnp.stack([ax, ay], -1).astype(jnp.float32)
                   .reshape(-1, 2) + 0.5) * stride

    assert out['pred_cls'].shape == (B, hw, num_classes)
    assert out['pred_reg'].shape == (B, (hw * num_coords) // (4 * reg_max),
                                     4 * reg_max)
    assert out['anchors'].shape == (hw, 2)
    assert out['stride_tensor'].shape == (hw, 1)
    assert jnp.allclose(out['pred_cls'].astype(jnp.float32), cls_ref,
                        atol=5e-2, rtol=2e-2)
    assert jnp.allclose(out['pred_reg'].astype(jnp.float32), reg_ref,
                        atol=1e-3, rtol=1e-3)
    assert jnp.allclose(out['anchors'], anchors_ref)
    assert jnp.allclose(out['stride_tensor'], jnp.full((hw, 1), float(stride)))

    print("KERNEL_OK")
</pallas_src>

<mosaic_0001>
module attributes {stable_mosaic.version = 11 : i64} {
  func.func @_fused_head_kernel(%arg0: i32, %arg1: i32, %arg2: memref<1x128x512xbf16, #tpu.memory_space<vmem>>, %arg3: memref<1x128x512xbf16, #tpu.memory_space<vmem>>, %arg4: memref<128x128xbf16, #tpu.memory_space<vmem>>, %arg5: memref<128x128xbf16, #tpu.memory_space<vmem>>, %arg6: memref<1x128xf32, #tpu.memory_space<vmem>>, %arg7: memref<1x512x128xbf16, #tpu.memory_space<vmem>>) attributes {dimension_semantics = [#tpu.dimension_semantics<parallel>, #tpu.dimension_semantics<parallel>], iteration_bounds = array<i64: 2, 1>, scalar_prefetch = 0 : i64, scratch_operands = 0 : i64, tpu.core_type = #tpu.core_type<tc>, window_params = [{transform_indices = @transform_0, window_bounds = array<i64: 1, 128, 512>}, {transform_indices = @transform_1, window_bounds = array<i64: 1, 128, 512>}, {pipeline_mode = #tpu.pipeline_mode<synchronous>, transform_indices = @transform_2, window_bounds = array<i64: 128, 128>}, {pipeline_mode = #tpu.pipeline_mode<synchronous>, transform_indices = @transform_3, window_bounds = array<i64: 128, 128>}, {pipeline_mode = #tpu.pipeline_mode<synchronous>, transform_indices = @transform_4, window_bounds = array<i64: 1, 128>}, {transform_indices = @transform_5, window_bounds = array<i64: 1, 512, 128>}]} {
    %c0 = arith.constant 0 : index
    %c0_0 = arith.constant 0 : index
    %0 = vector.load %arg4[%c0, %c0_0] : memref<128x128xbf16, #tpu.memory_space<vmem>>, vector<128x128xbf16>
    %c0_1 = arith.constant 0 : index
    %c0_2 = arith.constant 0 : index
    %c0_3 = arith.constant 0 : index
    %1 = vector.load %arg2[%c0_1, %c0_2, %c0_3] : memref<1x128x512xbf16, #tpu.memory_space<vmem>>, vector<1x128x512xbf16>
    %2 = vector.shape_cast %1 : vector<1x128x512xbf16> to vector<128x512xbf16>
    %cst = arith.constant dense<0.000000e+00> : vector<128x512xf32>
    %3 = tpu.matmul %0, %2, %cst {dimension_numbers = #tpu.dot_dimension_numbers<[1], [0], [0], [1], [0, 0, 1, 1], [], []>} : vector<128x128xbf16>, vector<128x512xbf16>, vector<128x512xf32> -> vector<128x512xf32>
    %c0_4 = arith.constant 0 : index
    %c0_5 = arith.constant 0 : index
    %4 = vector.load %arg5[%c0_4, %c0_5] : memref<128x128xbf16, #tpu.memory_space<vmem>>, vector<128x128xbf16>
    %c0_6 = arith.constant 0 : index
    %c0_7 = arith.constant 0 : index
    %c0_8 = arith.constant 0 : index
    %5 = vector.load %arg3[%c0_6, %c0_7, %c0_8] : memref<1x128x512xbf16, #tpu.memory_space<vmem>>, vector<1x128x512xbf16>
    %6 = vector.shape_cast %5 : vector<1x128x512xbf16> to vector<128x512xbf16>
    %cst_9 = arith.constant dense<0.000000e+00> : vector<128x512xf32>
    %7 = tpu.matmul %4, %6, %cst_9 {dimension_numbers = #tpu.dot_dimension_numbers<[1], [0], [0], [1], [0, 0, 1, 1], [], []>} : vector<128x128xbf16>, vector<128x512xbf16>, vector<128x512xf32> -> vector<128x512xf32>
    %8 = arith.addf %3, %7 : vector<128x512xf32>
    %9 = tpu.transpose %8, [1, 0] : vector<128x512xf32> -> vector<512x128xf32>
    %c0_10 = arith.constant 0 : index
    %c0_11 = arith.constant 0 : index
    %10 = vector.load %arg6[%c0_10, %c0_11] : memref<1x128xf32, #tpu.memory_space<vmem>>, vector<1x128xf32>
    %11 = vector.broadcast %10 : vector<1x128xf32> to vector<512x128xf32>
    %12 = arith.addf %9, %11 : vector<512x128xf32>
    %13 = arith.truncf %12 : vector<512x128xf32> to vector<512x128xbf16>
    %c0_12 = arith.constant 0 : index
    %c0_13 = arith.constant 0 : index
    %c0_14 = arith.constant 0 : index
    %14 = vector.load %arg7[%c0_12, %c0_13, %c0_14] : memref<1x512x128xbf16, #tpu.memory_space<vmem>>, vector<1x512x128xbf16>
    %15 = vector.shape_cast %14 : vector<1x512x128xbf16> to vector<512x128xbf16>
    %16 = vector.shape_cast %13 : vector<512x128xbf16> to vector<1x512x128xbf16>
    tpu.vector_store %arg7[%c0_12, %c0_13, %c0_14], %16 {strides = array<i32>} : memref<1x512x128xbf16, #tpu.memory_space<vmem>>, vector<1x512x128xbf16>,
    return
  }
  func.func @transform_0(%arg0: i32, %arg1: i32) -> (i32, i32, i32) {
    %c0_i32 = arith.constant 0 : i32
    %c0_i32_0 = arith.constant 0 : i32
    return %arg0, %c0_i32, %arg1 : i32, i32, i32
  }
  func.func @transform_1(%arg0: i32, %arg1: i32) -> (i32, i32, i32) {
    %c0_i32 = arith.constant 0 : i32
    %c0_i32_0 = arith.constant 0 : i32
    return %arg0, %c0_i32, %arg1 : i32, i32, i32
  }
  func.func @transform_2(%arg0: i32, %arg1: i32) -> (i32, i32) {
    %c0_i32 = arith.constant 0 : i32
    %c0_i32_0 = arith.constant 0 : i32
    %c0_i32_1 = arith.constant 0 : i32
    return %c0_i32, %c0_i32_0 : i32, i32
  }
  func.func @transform_3(%arg0: i32, %arg1: i32) -> (i32, i32) {
    %c0_i32 = arith.constant 0 : i32
    %c0_i32_0 = arith.constant 0 : i32
    %c0_i32_1 = arith.constant 0 : i32
    return %c0_i32, %c0_i32_0 : i32, i32
  }
  func.func @transform_4(%arg0: i32, %arg1: i32) -> (i32, i32) {
    %c0_i32 = arith.constant 0 : i32
    %c0_i32_0 = arith.constant 0 : i32
    %c0_i32_1 = arith.constant 0 : i32
    return %c0_i32, %c0_i32_0 : i32, i32
  }
  func.func @transform_5(%arg0: i32, %arg1: i32) -> (i32, i32, i32) {
    %c0_i32 = arith.constant 0 : i32
    %c0_i32_0 = arith.constant 0 : i32
    return %arg0, %arg1, %c0_i32 : i32, i32, i32
  }
}

</mosaic_0001>

<bundles_post_ra>
// kernel: tpu_custom_call.1
= control target key start
LH: loop header
LB: loop body
LE: loop exit
PB: predicated region body
PF: predicated region fallthrough
CT: control target
= control target key end

     0   :  { %10 = vsyncpa [#allocation3], 0  ;;  %s3072_s0 = inlined_call_operand.vmem [shape: bf16[2,128,400], index: 0, kind: input, shape index: {}]   ;;  %s3073_s1 = inlined_call_operand.vmem [shape: bf16[2,128,400], index: 1, kind: input, shape index: {}]   ;;  %s3074_s2 = inlined_call_operand.vmem [shape: bf16[128,128], index: 2, kind: input, shape index: {}]   ;;  %s3075_s3 = inlined_call_operand.vmem [shape: bf16[128,128], index: 3, kind: input, shape index: {}]   ;;  %s3076_s4 = inlined_call_operand.vmem [shape: f32[1,128], index: 4, kind: input, shape index: {}]   ;;  %s3077_s5 = inlined_call_operand.hbm [shape: bf16[2,400,128], index: 5, kind: output, shape index: {}]  }
   0x1   :  { %12 = vsyncpa [#allocation3 + $0x1], 0  ;;  %s2653_s18 = smov 0   ;;  %s2655_s19 = smov 0  }
   0x2   :  { %s2657_s20 = smov 0   ;;  %s2659_s21 = smov 0  }
   0x3   :  { %s2661_s22 = smov 0   ;;  %s2663_s23 = smov 0  }
   0x4 LB: > { %s1893_s24 = sadd.s32 4294967295, %s2617_s23   ;;  %s1894_s25 = sadd.s32 4294967294, %s2617_s23   ;;  %s2617_s23 = sphi %s2663_s23, %s18_s23   ;;  %s2613_s22 = sphi %s2661_s22, %s3084_s22   ;;  %s2609_s21 = sphi %s2659_s21, %s3083_s21   ;;  %s2605_s20 = sphi %s2657_s20, %s3082_s20   ;;  %s2601_s19 = sphi %s2655_s19, %s3081_s19   ;;  %s2597_s18 = sphi %s2653_s18, %s3080_s18  }
   0x5   : > { %s30_s26 = sadd.s32 1, %s2613_s22  ;;  %s158_s27 = sadd.s32 1, %s2605_s20 }
   0x6   : > { %p32_p0 = scmp.ge.s32.totalorder %s30_s26, 2  ;;  %p168_p1 = scmp.ne.s32.totalorder %s2605_s20, %s2601_s19 }
   0x7   : > { %p169_p2 = scmp.eq.s32.totalorder %s1893_s24, 1  ;;  %p174_p3 = scmp.ne.s32.totalorder %s2601_s19, %s2597_s18 }
   0x8   : > { %s3086_s26 = smov (%p32_p0, %s30_s26), 0  ;;  %p175_p5 = scmp.eq.s32.totalorder %s1894_s25, 1 }
   0x9   : > { %p2693_p4 = por %p169_p2, %p168_p1  ;;  %s153_s29 = ssub.s32 %s2613_s22, %s3086_s26 }
   0xa   : > { %p1897_p6 = scmp.ge.s32.totalorder %s2617_s23, 1  ;;  %p156_p7 = scmp.eq.s32.totalorder %s153_s29, 0 }
   0xb   : > { %p2700_p8 = por %p175_p5, %p174_p3  ;;  %p228_p9 = scmp.lt.s32.totalorder %s2617_s23, 3 }
   0xc   : > { %s2706_s6 = scalar_select %p156_p7, %s2605_s20, %s158_s27  }
   0xd   : > { %p229_p10 = pnand %p1897_p6, %p228_p9 }
   0xe   : > { %p270_p11 = scmp.lt.s32.totalorder (!%p229_p10), %s2609_s21, 1  ;;  %v2619_v0 = vmov (!%p229_p10), 0   ;;  %v2479_v35 = vld [vmem:[%s3075_s3] sm:$0xff] (!%p229_p10)   ;;  %v2483_v43 = vld [vmem:[%s3075_s3 + $0x8] sm:$0xff] (!%p229_p10)   ;;  %v2487_v50 = vld [vmem:[%s3075_s3 + $0x10] sm:$0xff] (!%p229_p10)   ;;  %s266_s17 = sand.u32 (!%p229_p10), 1, %s2601_s19  }
   0xf   : > { %232 = sbr.rel (%p229_p10) target bundleno = 619 (0x26b), region = 40  ;;  %629 = vmatprep.mubr.bf16.mxu0 (!%p229_p10), %v2619_v0  ;;  %742 = vmatprep.mubr.bf16.mxu1 (!%p229_p10), %v2619_v0  ;;  %v2491_v61 = vld [vmem:[%s3075_s3 + $0x18] sm:$0xff] (!%p229_p10)   ;;  %s1898_s27 = sshll.u32 (!%p229_p10), %s266_s17, 8 }
  0x10   : > { %s2931_s29 = scalar_lea.vmem (!%p229_p10), [#allocation2], %s1898_s27 }
  0x16   : > { %s2712_s7 = scalar_select %p270_p11, %s2609_s21, 1 }
  0x18   : > { %s2052_s8 = sshll.u32 %s2712_s7, 8  ;;  %s3027_s7 = scalar_lea.sflag [#allocation3], %s266_s17 }
  0x19   : > { %s2720_s11 = scalar_lea.vmem %s3073_s1, %s2052_s8  ;;  %s2750_s14 = scalar_lea.vmem %s3072_s0, %s2052_s8 }
  0x1a   : > { %v2431_v1 = vld [vmem:[%s2720_s11 + $0x4] ss:$16 sps:$4 sm:$0xff]   ;;  %v2433_v2 = vld [vmem:[%s2720_s11 + $0xc] ss:$16 sps:$4 sm:$0xff]   ;;  %v2435_v3 = vld [vmem:[%s2720_s11] ss:$16 sps:$4 sm:$0xff]  }
  0x1b   : > { %597 = vmatprep.subr.bf16.mxu0 %v2431_v1  ;;  %v2436_v4 = vld [vmem:[%s2720_s11 + $0x8] ss:$16 sps:$4 sm:$0xff]   ;;  %710 = vmatprep.subr.bf16.mxu1 %v2433_v2  ;;  %v2437_v5 = vld [vmem:[%s2720_s11 + $0x24] ss:$16 sps:$4 sm:$0xff]   ;;  %v2439_v6 = vld [vmem:[%s2720_s11 + $0x2c] ss:$16 sps:$4 sm:$0xff]  }
  0x1c   : > { %598 = vmatpush1.bf16.msra.mxu0 %v2435_v3  ;;  %711 = vmatpush1.bf16.msra.mxu1 %v2436_v4  ;;  %v2441_v7 = vld [vmem:[%s2720_s11 + $0x20] ss:$16 sps:$4 sm:$0xff]   ;;  %v2442_v8 = vld [vmem:[%s2720_s11 + $0x28] ss:$16 sps:$4 sm:$0xff]   ;;  %v2443_v9 = vld [vmem:[%s2720_s11 + $0x44] ss:$16 sps:$4 sm:$0xff]  }
  0x1d   : > { %599 = vmatprep.subr.bf16.mxu0 %v2437_v5  ;;  %712 = vmatprep.subr.bf16.mxu1 %v2439_v6  ;;  %v2445_v10 = vld [vmem:[%s2720_s11 + $0x4c] ss:$16 sps:$4 sm:$0xff]   ;;  %v2447_v11 = vld [vmem:[%s2720_s11 + $0x40] ss:$16 sps:$4 sm:$0xff]   ;;  %v2448_v12 = vld [vmem:[%s2720_s11 + $0x48] ss:$16 sps:$4 sm:$0xff]  }
  0x1e   : > { %v2449_v13 = vld [vmem:[%s2720_s11 + $0x64] ss:$16 sps:$4 sm:$0xff]   ;;  %v2451_v14 = vld [vmem:[%s2720_s11 + $0x6c] ss:$16 sps:$4 sm:$0xff]   ;;  %v2453_v15 = vld [vmem:[%s2720_s11 + $0x60] ss:$16 sps:$4 sm:$0xff]  }
  0x1f   : > { %v2454_v16 = vld [vmem:[%s2720_s11 + $0x68] ss:$16 sps:$4 sm:$0xff]   ;;  %v2455_v17 = vld [vmem:[%s2720_s11 + $0x84] ss:$16 sps:$4 sm:$0xff]   ;;  %v2457_v18 = vld [vmem:[%s2720_s11 + $0x8c] ss:$16 sps:$4 sm:$0xff]  }
  0x20   : > { %600 = vmatpush1.bf16.msra.mxu0 %v2441_v7  ;;  %713 = vmatpush1.bf16.msra.mxu1 %v2442_v8  ;;  %v2459_v19 = vld [vmem:[%s2720_s11 + $0x80] ss:$16 sps:$4 sm:$0xff]   ;;  %v2460_v20 = vld [vmem:[%s2720_s11 + $0x88] ss:$16 sps:$4 sm:$0xff]   ;;  %v2461_v21 = vld [vmem:[%s2720_s11 + $0xa4] ss:$16 sps:$4 sm:$0xff]  }
  0x21   : > { %601 = vmatprep.subr.bf16.mxu0 %v2443_v9  ;;  %714 = vmatprep.subr.bf16.mxu1 %v2445_v10  ;;  %v2463_v22 = vld [vmem:[%s2720_s11 + $0xac] ss:$16 sps:$4 sm:$0xff]   ;;  %v2465_v23 = vld [vmem:[%s2720_s11 + $0xa0] ss:$16 sps:$4 sm:$0xff]   ;;  %v2466_v24 = vld [vmem:[%s2720_s11 + $0xa8] ss:$16 sps:$4 sm:$0xff]  }
  0x22   : > { %v2467_v25 = vld [vmem:[%s2720_s11 + $0xc4] ss:$16 sps:$4 sm:$0xff]   ;;  %v2469_v26 = vld [vmem:[%s2720_s11 + $0xcc] ss:$16 sps:$4 sm:$0xff]   ;;  %v2471_v27 = vld [vmem:[%s2720_s11 + $0xc0] ss:$16 sps:$4 sm:$0xff]  }
  0x23   : > { %v2472_v28 = vld [vmem:[%s2720_s11 + $0xc8] ss:$16 sps:$4 sm:$0xff]   ;;  %v2473_v29 = vld [vmem:[%s2720_s11 + $0xe4] ss:$16 sps:$4 sm:$0xff]   ;;  %v2475_v30 = vld [vmem:[%s2720_s11 + $0xec] ss:$16 sps:$4 sm:$0xff]  }
  0x24   : > { %602 = vmatpush1.bf16.msra.mxu0 %v2447_v11  ;;  %715 = vmatpush1.bf16.msra.mxu1 %v2448_v12  ;;  %v2477_v31 = vld [vmem:[%s2720_s11 + $0xe0] ss:$16 sps:$4 sm:$0xff]   ;;  %v2478_v32 = vld [vmem:[%s2720_s11 + $0xe8] ss:$16 sps:$4 sm:$0xff]   ;;  %v2482_v33 = vld [vmem:[%s2750_s14 + $0x4] ss:$16 sps:$4 sm:$0xff]  }
  0x25   : > { %603 = vmatprep.subr.bf16.mxu0 %v2449_v13  ;;  %716 = vmatprep.subr.bf16.mxu1 %v2451_v14  ;;  %v2501_v34 = vld [vmem:[%s2750_s14 + $0xc] ss:$16 sps:$4 sm:$0xff]   ;;  %v2480_v36 = vld [vmem:[%s2750_s14] ss:$16 sps:$4 sm:$0xff]   ;;  %v2486_v37 = vld [vmem:[%s2750_s14 + $0x24] ss:$16 sps:$4 sm:$0xff]  }
  0x26   : > { %v2499_v38 = vld [vmem:[%s2750_s14 + $0x8] ss:$16 sps:$4 sm:$0xff]   ;;  %v2504_v39 = vld [vmem:[%s2750_s14 + $0x2c] ss:$16 sps:$4 sm:$0xff]   ;;  %v2484_v40 = vld [vmem:[%s2750_s14 + $0x20] ss:$16 sps:$4 sm:$0xff]  }
  0x27   : > { %v2490_v41 = vld [vmem:[%s2750_s14 + $0x44] ss:$16 sps:$4 sm:$0xff]   ;;  %v2502_v42 = vld [vmem:[%s2750_s14 + $0x28] ss:$16 sps:$4 sm:$0xff]   ;;  %v2488_v44 = vld [vmem:[%s2750_s14 + $0x40] ss:$16 sps:$4 sm:$0xff]  }
  0x28   : > { %604 = vmatpush1.bf16.msra.mxu0 %v2453_v15  ;;  %717 = vmatpush1.bf16.msra.mxu1 %v2454_v16  ;;  %v2494_v45 = vld [vmem:[%s2750_s14 + $0x64] ss:$16 sps:$4 sm:$0xff]   ;;  %v2511_v46 = vld [vmem:[%s2750_s14 + $0x4c] ss:$16 sps:$4 sm:$0xff]   ;;  %v2509_v47 = vld [vmem:[%s2750_s14 + $0x48] ss:$16 sps:$4 sm:$0xff]  }
  0x29   : > { %605 = vmatprep.subr.bf16.mxu0 %v2455_v17  ;;  %718 = vmatprep.subr.bf16.mxu1 %v2457_v18  ;;  %v2514_v48 = vld [vmem:[%s2750_s14 + $0x6c] ss:$16 sps:$4 sm:$0xff]   ;;  %v2492_v49 = vld [vmem:[%s2750_s14 + $0x60] ss:$16 sps:$4 sm:$0xff]   ;;  %v2498_v51 = vld [vmem:[%s2750_s14 + $0x84] ss:$16 sps:$4 sm:$0xff]  }
  0x2a   : > { %v2512_v52 = vld [vmem:[%s2750_s14 + $0x68] ss:$16 sps:$4 sm:$0xff]   ;;  %v2496_v53 = vld [vmem:[%s2750_s14 + $0x80] ss:$16 sps:$4 sm:$0xff]   ;;  %v2508_v54 = vld [vmem:[%s2750_s14 + $0xa4] ss:$16 sps:$4 sm:$0xff]  }
  0x2b   : > { %v2521_v55 = vld [vmem:[%s2750_s14 + $0x8c] ss:$16 sps:$4 sm:$0xff]   ;;  %v2519_v56 = vld [vmem:[%s2750_s14 + $0x88] ss:$16 sps:$4 sm:$0xff]   ;;  %v2506_v58 = vld [vmem:[%s2750_s14 + $0xa0] ss:$16 sps:$4 sm:$0xff]  }
  0x2c   : > { %606 = vmatpush1.bf16.msra.mxu0 %v2459_v19  ;;  %719 = vmatpush1.bf16.msra.mxu1 %v2460_v20  ;;  %v2524_v57 = vld [vmem:[%s2750_s14 + $0xac] ss:$16 sps:$4 sm:$0xff]   ;;  %v2518_v59 = vld [vmem:[%s2750_s14 + $0xc4] ss:$16 sps:$4 sm:$0xff]   ;;  %v2522_v60 = vld [vmem:[%s2750_s14 + $0xa8] ss:$16 sps:$4 sm:$0xff]  }
  0x2d   : > { %607 = vmatprep.subr.bf16.mxu0 %v2461_v21  ;;  %720 = vmatprep.subr.bf16.mxu1 %v2463_v22  ;;  %v2516_v62 = vld [vmem:[%s2750_s14 + $0xc0] ss:$16 sps:$4 sm:$0xff]   ;;  %v2531_v63 = vld [vmem:[%s2750_s14 + $0xcc] ss:$16 sps:$4 sm:$0xff]   ;;  %v2528_v1 = vld [vmem:[%s2750_s14 + $0xe4] ss:$16 sps:$4 sm:$0xff]  }
  0x2e   : > { %v2529_v2 = vld [vmem:[%s2750_s14 + $0xc8] ss:$16 sps:$4 sm:$0xff]   ;;  %v2534_v3 = vld [vmem:[%s2750_s14 + $0xec] ss:$16 sps:$4 sm:$0xff]   ;;  %v2526_v4 = vld [vmem:[%s2750_s14 + $0xe0] ss:$16 sps:$4 sm:$0xff]  }
  0x2f   : > { %v2532_v5 = vld [vmem:[%s2750_s14 + $0xe8] ss:$16 sps:$4 sm:$0xff]   ;;  %v2495_v6 = vld [vmem:[%s3075_s3 + $0x20] sm:$0xff]   ;;  %v2515_v8 = vld [vmem:[%s3075_s3 + $0x30] sm:$0xff]  }
  0x30   : > { %608 = vmatpush1.bf16.msra.mxu0 %v2465_v23  ;;  %721 = vmatpush1.bf16.msra.mxu1 %v2466_v24  ;;  %v2505_v7 = vld [vmem:[%s3075_s3 + $0x28] sm:$0xff]   ;;  %v2525_v9 = vld [vmem:[%s3075_s3 + $0x38] sm:$0xff]   ;;  %v2535_v10 = vld [vmem:[%s3074_s2] sm:$0xff]  }
  0x31   : > { %609 = vmatprep.subr.bf16.mxu0 %v2467_v25  ;;  %722 = vmatprep.subr.bf16.mxu1 %v2469_v26  ;;  %v2536_v11 = vld [vmem:[%s3074_s2 + $0x8] sm:$0xff]   ;;  %v2537_v12 = vld [vmem:[%s3074_s2 + $0x10] sm:$0xff]   ;;  %v2538_v13 = vld [vmem:[%s3074_s2 + $0x18] sm:$0xff]  }
  0x32   : > { %v2539_v14 = vld [vmem:[%s3074_s2 + $0x20] sm:$0xff]   ;;  %v2540_v15 = vld [vmem:[%s3074_s2 + $0x28] sm:$0xff]   ;;  %v2541_v16 = vld [vmem:[%s3074_s2 + $0x30] sm:$0xff]  }
  0x33   : > { %v2542_v17 = vld [vmem:[%s3074_s2 + $0x38] sm:$0xff]  }
  0x34   : > { %610 = vmatpush1.bf16.msra.mxu0 %v2471_v27  ;;  %723 = vmatpush1.bf16.msra.mxu1 %v2472_v28 }
  0x35   : > { %611 = vmatprep.subr.bf16.mxu0 %v2473_v29  ;;  %724 = vmatprep.subr.bf16.mxu1 %v2475_v30 }
  0x38   : > { %612 = vmatpush1.bf16.msra.mxu0 %v2477_v31  ;;  %725 = vmatpush1.bf16.msra.mxu1 %v2478_v32 }
  0x39   : > { %1031 = vmatprep.subr.bf16.mxu0 %v2482_v33  ;;  %1144 = vmatprep.subr.bf16.mxu1 %v2501_v34 }
  0x3b   : > { %630 = vmatmul.mubr.bf16.vlgmr.msra.gmra.mrb[0].mxu0 %v2479_v35  ;;  %743 = vmatmul.mubr.bf16.vlgmr.msra.gmra.mrb[0].mxu1 %v2479_v35 }
  0x3c   : > { %1032 = vmatpush1.bf16.msra.mxu0 %v2480_v36  ;;  %639 = vmatprep.mubr.bf16.mxu0 %v2619_v0 }
  0x3d   : > { %752 = vmatprep.mubr.bf16.mxu1 %v2619_v0  ;;  %1033 = vmatprep.subr.bf16.mxu0 %v2486_v37 }
  0x3e   : > { %1145 = vmatpush1.bf16.msra.mxu1 %v2499_v38 }
  0x3f   : > { %1146 = vmatprep.subr.bf16.mxu1 %v2504_v39 }
  0x40   : > { %1034 = vmatpush1.bf16.msra.mxu0 %v2484_v40 }
  0x41   : > { %1035 = vmatprep.subr.bf16.mxu0 %v2490_v41 }
  0x42   : > { %1147 = vmatpush1.bf16.msra.mxu1 %v2502_v42 }
  0x43   : > { %640 = vmatmul.mubr.bf16.gmra.mrb[4].mxu0 %v2483_v43  ;;  %753 = vmatmul.mubr.bf16.gmra.mrb[4].mxu1 %v2483_v43 }
  0x44   : > { %649 = vmatprep.mubr.bf16.mxu0 %v2619_v0  ;;  %762 = vmatprep.mubr.bf16.mxu1 %v2619_v0 }
  0x45   : > { %1036 = vmatpush1.bf16.msra.mxu0 %v2488_v44  ;;  %1148 = vmatprep.subr.bf16.mxu1 %v2511_v46 }
  0x46   : > { %1037 = vmatprep.subr.bf16.mxu0 %v2494_v45  ;;  %1149 = vmatpush1.bf16.msra.mxu1 %v2509_v47 }
  0x47   : > { %1150 = vmatprep.subr.bf16.mxu1 %v2514_v48 }
  0x49   : > { %1038 = vmatpush1.bf16.msra.mxu0 %v2492_v49 }
  0x4a   : > { %1039 = vmatprep.subr.bf16.mxu0 %v2498_v51  ;;  %1151 = vmatpush1.bf16.msra.mxu1 %v2512_v52 }
  0x4b   : > { %650 = vmatmul.mubr.bf16.gmra.mrb[8].mxu0 %v2487_v50  ;;  %763 = vmatmul.mubr.bf16.gmra.mrb[8].mxu1 %v2487_v50 }
  0x4c   : > { %659 = vmatprep.mubr.bf16.mxu0 %v2619_v0  ;;  %772 = vmatprep.mubr.bf16.mxu1 %v2619_v0 }
  0x4d   : > { %1040 = vmatpush1.bf16.msra.mxu0 %v2496_v53  ;;  %1152 = vmatprep.subr.bf16.mxu1 %v2521_v55 }
  0x4e   : > { %1041 = vmatprep.subr.bf16.mxu0 %v2508_v54  ;;  %1153 = vmatpush1.bf16.msra.mxu1 %v2519_v56 }
  0x4f   : > { %1154 = vmatprep.subr.bf16.mxu1 %v2524_v57 }
  0x51   : > { %1042 = vmatpush1.bf16.msra.mxu0 %v2506_v58 }
  0x52   : > { %1043 = vmatprep.subr.bf16.mxu0 %v2518_v59  ;;  %1155 = vmatpush1.bf16.msra.mxu1 %v2522_v60 }
  0x53   : > { %660 = vmatmul.mubr.bf16.gmra.mrb[12].mxu0 %v2491_v61  ;;  %773 = vmatmul.mubr.bf16.gmra.mrb[12].mxu1 %v2491_v61 }
  0x54   : > { %669 = vmatprep.mubr.bf16.mxu0 %v2619_v0  ;;  %782 = vmatprep.mubr.bf16.mxu1 %v2619_v0 }
  0x55   : > { %1044 = vmatpush1.bf16.msra.mxu0 %v2516_v62  ;;  %1156 = vmatprep.subr.bf16.mxu1 %v2531_v63 }
  0x56   : > { %1045 = vmatprep.subr.bf16.mxu0 %v2528_v1  ;;  %1157 = vmatpush1.bf16.msra.mxu1 %v2529_v2 }
  0x57   : > { %1158 = vmatprep.subr.bf16.mxu1 %v2534_v3 }
  0x59   : > { %1046 = vmatpush1.bf16.msra.mxu0 %v2526_v4 }
  0x5a   : > { %1159 = vmatpush1.bf16.msra.mxu1 %v2532_v5 }
  0x5b   : > { %670 = vmatmul.mubr.bf16.gmra.mrb[16].mxu0 %v2495_v6  ;;  %783 = vmatmul.mubr.bf16.gmra.mrb[16].mxu1 %v2495_v6 }
  0x5c   : > { %679 = vmatprep.mubr.bf16.mxu0 %v2619_v0  ;;  %792 = vmatprep.mubr.bf16.mxu1 %v2619_v0 }
  0x63   : > { %680 = vmatmul.mubr.bf16.gmra.mrb[20].mxu0 %v2505_v7  ;;  %793 = vmatmul.mubr.bf16.gmra.mrb[20].mxu1 %v2505_v7 }
  0x64   : > { %689 = vmatprep.mubr.bf16.mxu0 %v2619_v0  ;;  %802 = vmatprep.mubr.bf16.mxu1 %v2619_v0 }
  0x6b   : > { %690 = vmatmul.mubr.bf16.gmra.mrb[24].mxu0 %v2515_v8  ;;  %803 = vmatmul.mubr.bf16.gmra.mrb[24].mxu1 %v2515_v8 }
  0x6c   : > { %699 = vmatprep.mubr.bf16.mxu0 %v2619_v0  ;;  %812 = vmatprep.mubr.bf16.mxu1 %v2619_v0 }
  0x73   : > { %700 = vmatmul.mubr.bf16.gmra.mrb[28].mxu0 %v2525_v9  ;;  %813 = vmatmul.mubr.bf16.gmra.mrb[28].mxu1 %v2525_v9 }
  0x74   : > { %1063 = vmatprep.mubr.bf16.mxu0 %v2619_v0  ;;  %1176 = vmatprep.mubr.bf16.mxu1 %v2619_v0 }
  0x7b   : > { %1064 = vmatmul.mubr.bf16.vlgmr.msra.gmra.mrb[0].mxu0 %v2535_v10  ;;  %1177 = vmatmul.mubr.bf16.vlgmr.msra.gmra.mrb[0].mxu1 %v2535_v10 }
  0x7c   : > { %1073 = vmatprep.mubr.bf16.mxu0 %v2619_v0  ;;  %1186 = vmatprep.mubr.bf16.mxu1 %v2619_v0 }
  0x83   : > { %1074 = vmatmul.mubr.bf16.gmra.mrb[4].mxu0 %v2536_v11  ;;  %1187 = vmatmul.mubr.bf16.gmra.mrb[4].mxu1 %v2536_v11 }
  0x84   : > { %1083 = vmatprep.mubr.bf16.mxu0 %v2619_v0  ;;  %1196 = vmatprep.mubr.bf16.mxu1 %v2619_v0 }
  0x8b   : > { %1084 = vmatmul.mubr.bf16.gmra.mrb[8].mxu0 %v2537_v12  ;;  %1197 = vmatmul.mubr.bf16.gmra.mrb[8].mxu1 %v2537_v12 }
  0x8c   : > { %1093 = vmatprep.mubr.bf16.mxu0 %v2619_v0  ;;  %1206 = vmatprep.mubr.bf16.mxu1 %v2619_v0 }
  0x93   : > { %1094 = vmatmul.mubr.bf16.gmra.mrb[12].mxu0 %v2538_v13  ;;  %1207 = vmatmul.mubr.bf16.gmra.mrb[12].mxu1 %v2538_v13 }
  0x94   : > { %1103 = vmatprep.mubr.bf16.mxu0 %v2619_v0  ;;  %1216 = vmatprep.mubr.bf16.mxu1 %v2619_v0 }
  0x9b   : > { %1104 = vmatmul.mubr.bf16.gmra.mrb[16].mxu0 %v2539_v14  ;;  %1217 = vmatmul.mubr.bf16.gmra.mrb[16].mxu1 %v2539_v14 }
  0x9c   : > { %1113 = vmatprep.mubr.bf16.mxu0 %v2619_v0  ;;  %1226 = vmatprep.mubr.bf16.mxu1 %v2619_v0 }
  0xa3   : > { %1114 = vmatmul.mubr.bf16.gmra.mrb[20].mxu0 %v2540_v15  ;;  %1227 = vmatmul.mubr.bf16.gmra.mrb[20].mxu1 %v2540_v15 }
  0xa4   : > { %1123 = vmatprep.mubr.bf16.mxu0 %v2619_v0  ;;  %1236 = vmatprep.mubr.bf16.mxu1 %v2619_v0 }
  0xab   : > { %1124 = vmatmul.mubr.bf16.gmra.mrb[24].mxu0 %v2541_v16  ;;  %1237 = vmatmul.mubr.bf16.gmra.mrb[24].mxu1 %v2541_v16 }
  0xac   : > { %1133 = vmatprep.mubr.bf16.mxu0 %v2619_v0  ;;  %1246 = vmatprep.mubr.bf16.mxu1 %v2619_v0 }
  0xb3   : > { %1134 = vmatmul.mubr.bf16.gmra.mrb[28].mxu0 %v2542_v17  ;;  %1247 = vmatmul.mubr.bf16.gmra.mrb[28].mxu1 %v2542_v17 }
 0x14e   : > { %v1065_v18 = vpop.f32.mrb[0].mxu0  ;;  %v2871_v19 = vpop.f32.mrb[0].mxu1 }
 0x14f   : > { %v2873_v20 = vpop.f32.mrb[1].mxu1  ;;  %1257 = vxpose.xlu0.b32.start [1/16] %v1065_v18, 128  ;;  %v1067_v21 = vpop.f32.mrb[1].mxu0 }
 0x150   : > { %v2875_v22 = vpop.f32.mrb[2].mxu1  ;;  %1289 = vxpose.xlu1.b32.start [1/16] %v1067_v21, 128  ;;  %v1069_v23 = vpop.f32.mrb[2].mxu0 }
 0x151   : > { %v1071_v24 = vpop.f32.mrb[3].mxu0  ;;  %v2877_v0 = vpop.f32.mrb[3].mxu1 }
 0x153   : > { %1258 = vxpose.xlu0.b32.cont [2/16] %v1069_v23, 128 }
 0x154   : > { %1290 = vxpose.xlu1.b32.cont [2/16] %v1071_v24, 128 }
 0x156   : > { %v1075_v25 = vpop.f32.mrb[4].mxu0  ;;  %v2879_v26 = vpop.f32.mrb[4].mxu1 }
 0x157   : > { %v2881_v27 = vpop.f32.mrb[5].mxu1  ;;  %1259 = vxpose.xlu0.b32.cont [3/16] %v1075_v25, 128  ;;  %v1077_v28 = vpop.f32.mrb[5].mxu0 }
 0x158   : > { %v2884_v29 = vpop.f32.mrb[6].mxu1  ;;  %1291 = vxpose.xlu1.b32.cont [3/16] %v1077_v28, 128  ;;  %v1079_v30 = vpop.f32.mrb[6].mxu0 }
 0x159   : > { %v1081_v31 = vpop.f32.mrb[7].mxu0  ;;  %v2886_v32 = vpop.f32.mrb[7].mxu1 }
 0x15b   : > { %1260 = vxpose.xlu0.b32.cont [4/16] %v1079_v30, 128 }
 0x15c   : > { %1292 = vxpose.xlu1.b32.cont [4/16] %v1081_v31, 128 }
 0x15e   : > { %v1085_v33 = vpop.f32.mrb[8].mxu0  ;;  %v2888_v34 = vpop.f32.mrb[8].mxu1 }
 0x15f   : > { %v2890_v35 = vpop.f32.mrb[9].mxu1  ;;  %1261 = vxpose.xlu0.b32.cont [5/16] %v1085_v33, 128  ;;  %v1087_v36 = vpop.f32.mrb[9].mxu0 }
 0x160   : > { %v2892_v37 = vpop.f32.mrb[10].mxu1  ;;  %1293 = vxpose.xlu1.b32.cont [5/16] %v1087_v36, 128  ;;  %v1089_v38 = vpop.f32.mrb[10].mxu0 }
 0x161   : > { %v1091_v39 = vpop.f32.mrb[11].mxu0  ;;  %v2894_v40 = vpop.f32.mrb[11].mxu1 }
 0x163   : > { %1262 = vxpose.xlu0.b32.cont [6/16] %v1089_v38, 128 }
 0x164   : > { %1294 = vxpose.xlu1.b32.cont [6/16] %v1091_v39, 128 }
 0x166   : > { %v1095_v41 = vpop.f32.mrb[12].mxu0  ;;  %v2896_v42 = vpop.f32.mrb[12].mxu1 }
 0x167   : > { %v2898_v43 = vpop.f32.mrb[13].mxu1  ;;  %1263 = vxpose.xlu0.b32.cont [7/16] %v1095_v41, 128  ;;  %v1097_v44 = vpop.f32.mrb[13].mxu0 }
 0x168   : > { %v2900_v45 = vpop.f32.mrb[14].mxu1  ;;  %1295 = vxpose.xlu1.b32.cont [7/16] %v1097_v44, 128  ;;  %v1099_v46 = vpop.f32.mrb[14].mxu0 }
 0x169   : > { %v1101_v47 = vpop.f32.mrb[15].mxu0  ;;  %v2902_v48 = vpop.f32.mrb[15].mxu1 }
 0x16b   : > { %1264 = vxpose.xlu0.b32.cont [8/16] %v1099_v46, 128 }
 0x16c   : > { %1296 = vxpose.xlu1.b32.cont [8/16] %v1101_v47, 128 }
 0x16e   : > { %v1105_v49 = vpop.f32.mrb[16].mxu0  ;;  %v1218_v50 = vpop.f32.mrb[16].mxu1 }
 0x16f   : > { %v1220_v51 = vpop.f32.mrb[17].mxu1  ;;  %1265 = vxpose.xlu0.b32.cont [9/16] %v1105_v49, 128  ;;  %v1107_v52 = vpop.f32.mrb[17].mxu0 }
 0x170   : > { %v1222_v53 = vpop.f32.mrb[18].mxu1  ;;  %1297 = vxpose.xlu1.b32.cont [9/16] %v1107_v52, 128  ;;  %v1109_v54 = vpop.f32.mrb[18].mxu0 }
 0x171   : > { %v1111_v55 = vpop.f32.mrb[19].mxu0  ;;  %v1224_v56 = vpop.f32.mrb[19].mxu1 }
 0x173   : > { %1266 = vxpose.xlu0.b32.cont [10/16] %v1109_v54, 128 }
 0x174   : > { %1298 = vxpose.xlu1.b32.cont [10/16] %v1111_v55, 128 }
 0x176   : > { %v1115_v57 = vpop.f32.mrb[20].mxu0  ;;  %v1228_v58 = vpop.f32.mrb[20].mxu1 }
 0x177   : > { %v1230_v59 = vpop.f32.mrb[21].mxu1  ;;  %1267 = vxpose.xlu0.b32.cont [11/16] %v1115_v57, 128  ;;  %v1117_v60 = vpop.f32.mrb[21].mxu0 }
 0x178   : > { %v1232_v61 = vpop.f32.mrb[22].mxu1  ;;  %1299 = vxpose.xlu1.b32.cont [11/16] %v1117_v60, 128  ;;  %v1119_v62 = vpop.f32.mrb[22].mxu0 }
 0x179   : > { %v1121_v63 = vpop.f32.mrb[23].mxu0  ;;  %v1234_v1 = vpop.f32.mrb[23].mxu1 }
 0x17b   : > { %1268 = vxpose.xlu0.b32.cont [12/16] %v1119_v62, 128 }
 0x17c   : > { %1300 = vxpose.xlu1.b32.cont [12/16] %v1121_v63, 128 }
 0x17e   : > { %v1125_v2 = vpop.f32.mrb[24].mxu0  ;;  %v1238_v3 = vpop.f32.mrb[24].mxu1 }
 0x17f   : > { %v1240_v4 = vpop.f32.mrb[25].mxu1  ;;  %1269 = vxpose.xlu0.b32.cont [13/16] %v1125_v2, 128  ;;  %v1127_v5 = vpop.f32.mrb[25].mxu0 }
 0x180   : > { %v1242_v6 = vpop.f32.mrb[26].mxu1  ;;  %1301 = vxpose.xlu1.b32.cont [13/16] %v1127_v5, 128  ;;  %v1129_v7 = vpop.f32.mrb[26].mxu0 }
 0x181   : > { %v1131_v8 = vpop.f32.mrb[27].mxu0  ;;  %v1244_v9 = vpop.f32.mrb[27].mxu1 }
 0x183   : > { %1270 = vxpose.xlu0.b32.cont [14/16] %v1129_v7, 128 }
 0x184   : > { %1302 = vxpose.xlu1.b32.cont [14/16] %v1131_v8, 128 }
 0x186   : > { %v1135_v10 = vpop.f32.mrb[28].mxu0  ;;  %v1248_v11 = vpop.f32.mrb[28].mxu1 }
 0x187   : > { %v1250_v12 = vpop.f32.mrb[29].mxu1  ;;  %1271 = vxpose.xlu0.b32.cont [15/16] %v1135_v10, 128  ;;  %v1137_v13 = vpop.f32.mrb[29].mxu0 }
 0x188   : > { %v1252_v14 = vpop.f32.mrb[30].mxu1  ;;  %1303 = vxpose.xlu1.b32.cont [15/16] %v1137_v13, 128  ;;  %v1139_v15 = vpop.f32.mrb[30].mxu0 }
 0x189   : > { %v1141_v16 = vpop.f32.mrb[31].mxu0  ;;  %v1254_v17 = vpop.f32.mrb[31].mxu1 }
 0x18b   : > { %1272 = vxpose.xlu0.b32.end [16/16] %v1139_v15, 128 }
 0x18c   : > { %1304 = vxpose.xlu1.b32.end [16/16] %v1141_v16, 128 }
 0x18f   : > { %1321 = vxpose.xlu0.b32.start [1/16] %v2871_v19, 128 }
 0x190   : > { %1353 = vxpose.xlu1.b32.start [1/16] %v2873_v20, 128  ;;  %v2923_v20 = vld [vmem:[%s3076_s4] ss:$0 sm:$0xff] }
 0x193   : > { %1322 = vxpose.xlu0.b32.cont [2/16] %v2875_v22, 128 }
 0x194   : > { %1354 = vxpose.xlu1.b32.cont [2/16] %v2877_v0, 128 }
 0x197   : > { %1323 = vxpose.xlu0.b32.cont [3/16] %v2879_v26, 128 }
 0x198   : > { %1355 = vxpose.xlu1.b32.cont [3/16] %v2881_v27, 128 }
 0x19b   : > { %1324 = vxpose.xlu0.b32.cont [4/16] %v2884_v29, 128 }
 0x19c   : > { %1356 = vxpose.xlu1.b32.cont [4/16] %v2886_v32, 128 }
 0x19f   : > { %1325 = vxpose.xlu0.b32.cont [5/16] %v2888_v34, 128 }
 0x1a0   : > { %1357 = vxpose.xlu1.b32.cont [5/16] %v2890_v35, 128 }
 0x1a3   : > { %1326 = vxpose.xlu0.b32.cont [6/16] %v2892_v37, 128 }
 0x1a4   : > { %1358 = vxpose.xlu1.b32.cont [6/16] %v2894_v40, 128 }
 0x1a7   : > { %1327 = vxpose.xlu0.b32.cont [7/16] %v2896_v42, 128 }
 0x1a8   : > { %1359 = vxpose.xlu1.b32.cont [7/16] %v2898_v43, 128 }
 0x1ab   : > { %1328 = vxpose.xlu0.b32.cont [8/16] %v2900_v45, 128 }
 0x1ac   : > { %1360 = vxpose.xlu1.b32.cont [8/16] %v2902_v48, 128 }
 0x1af   : > { %1329 = vxpose.xlu0.b32.cont [9/16] %v1218_v50, 128 }
 0x1b0   : > { %1361 = vxpose.xlu1.b32.cont [9/16] %v1220_v51, 128 }
 0x1b3   : > { %1330 = vxpose.xlu0.b32.cont [10/16] %v1222_v53, 128 }
 0x1b4   : > { %1362 = vxpose.xlu1.b32.cont [10/16] %v1224_v56, 128 }
 0x1b7   : > { %1331 = vxpose.xlu0.b32.cont [11/16] %v1228_v58, 128 }
 0x1b8   : > { %1363 = vxpose.xlu1.b32.cont [11/16] %v1230_v59, 128 }
 0x1bb   : > { %1332 = vxpose.xlu0.b32.cont [12/16] %v1232_v61, 128 }
 0x1bc   : > { %1364 = vxpose.xlu1.b32.cont [12/16] %v1234_v1, 128 }
 0x1bf   : > { %1333 = vxpose.xlu0.b32.cont [13/16] %v1238_v3, 128 }
 0x1c0   : > { %1365 = vxpose.xlu1.b32.cont [13/16] %v1240_v4, 128 }
 0x1c3   : > { %1334 = vxpose.xlu0.b32.cont [14/16] %v1242_v6, 128 }
 0x1c4   : > { %1366 = vxpose.xlu1.b32.cont [14/16] %v1244_v9, 128 }
 0x1c7   : > { %1335 = vxpose.xlu0.b32.cont [15/16] %v1248_v11, 128 }
 0x1c8   : > { %1367 = vxpose.xlu1.b32.cont [15/16] %v1250_v12, 128 }
 0x1cb   : > { %1336 = vxpose.xlu0.b32.end [16/16] %v1252_v14, 128 }
 0x1cc   : > { %1368 = vxpose.xlu1.b32.end [16/16] %v1254_v17, 128 }
 0x1cf   : > { %v1273_v18 = vpop.trf.xlu0 }
 0x1d0   : > { %v1305_v19 = vpop.trf.xlu1  ;;  %v1392_v22 = vadd.f32 %v2923_v20, %v1273_v18 }
 0x1d1   : > { %v1408_v0 = vadd.f32 %v2923_v20, %v1305_v19 }
 0x1d3   : > { %v1274_v21 = vpop.trf.xlu0 }
 0x1d4   : > { %v1393_v23 = vadd.f32 %v2923_v20, %v1274_v21  ;;  %v1306_v24 = vpop.trf.xlu1 }
 0x1d5   : > { %v1409_v25 = vadd.f32 %v2923_v20, %v1306_v24 }
 0x1d6   : > { %v2121_v26 = vpack.c.bf16 %v1393_v23, %v1392_v22 }
 0x1d7   : > { %v2161_v27 = vpack.c.bf16 %v1409_v25, %v1408_v0  ;;  %v1275_v28 = vpop.trf.xlu0 }
 0x1d8   : > { %2122 = vst [vmem:[%s2931_s29] sm:$0xff] %v2121_v26   ;;  %v1307_v29 = vpop.trf.xlu1  ;;  %v1394_v31 = vadd.f32 %v2923_v20, %v1275_v28 }
 0x1d9   : > { %2285 = vst [vmem:[%s2931_s29 + $0x40] sm:$0xff] %v2161_v27   ;;  %v1410_v34 = vadd.f32 %v2923_v20, %v1307_v29 }
 0x1db   : > { %v1276_v30 = vpop.trf.xlu0 }
 0x1dc   : > { %v1395_v32 = vadd.f32 %v2923_v20, %v1276_v30  ;;  %v1308_v33 = vpop.trf.xlu1 }
 0x1dd   : > { %v1411_v35 = vadd.f32 %v2923_v20, %v1308_v33 }
 0x1de   : > { %v2126_v36 = vpack.c.bf16 %v1395_v32, %v1394_v31 }
 0x1df   : > { %v2166_v37 = vpack.c.bf16 %v1411_v35, %v1410_v34  ;;  %v1277_v38 = vpop.trf.xlu0 }
 0x1e0   : > { %2278 = vst [vmem:[%s2931_s29 + $0x8] sm:$0xff] %v2126_v36   ;;  %v1309_v39 = vpop.trf.xlu1  ;;  %v1396_v41 = vadd.f32 %v2923_v20, %v1277_v38 }
 0x1e1   : > { %2286 = vst [vmem:[%s2931_s29 + $0x48] sm:$0xff] %v2166_v37   ;;  %v1412_v44 = vadd.f32 %v2923_v20, %v1309_v39 }
 0x1e3   : > { %v1278_v40 = vpop.trf.xlu0 }
 0x1e4   : > { %v1397_v42 = vadd.f32 %v2923_v20, %v1278_v40  ;;  %v1310_v43 = vpop.trf.xlu1 }
 0x1e5   : > { %v1413_v45 = vadd.f32 %v2923_v20, %v1310_v43 }
 0x1e6   : > { %v2131_v46 = vpack.c.bf16 %v1397_v42, %v1396_v41 }
 0x1e7   : > { %v2171_v47 = vpack.c.bf16 %v1413_v45, %v1412_v44  ;;  %v1279_v48 = vpop.trf.xlu0 }
 0x1e8   : > { %2279 = vst [vmem:[%s2931_s29 + $0x10] sm:$0xff] %v2131_v46   ;;  %v1311_v49 = vpop.trf.xlu1  ;;  %v1398_v51 = vadd.f32 %v2923_v20, %v1279_v48 }
 0x1e9   : > { %2287 = vst [vmem:[%s2931_s29 + $0x50] sm:$0xff] %v2171_v47   ;;  %v1414_v54 = vadd.f32 %v2923_v20, %v1311_v49 }
 0x1eb   : > { %v1280_v50 = vpop.trf.xlu0 }
 0x1ec   : > { %v1399_v52 = vadd.f32 %v2923_v20, %v1280_v50  ;;  %v1312_v53 = vpop.trf.xlu1 }
 0x1ed   : > { %v1415_v55 = vadd.f32 %v2923_v20, %v1312_v53 }
 0x1ee   : > { %v2136_v56 = vpack.c.bf16 %v1399_v52, %v1398_v51 }
 0x1ef   : > { %v2176_v57 = vpack.c.bf16 %v1415_v55, %v1414_v54  ;;  %v1281_v58 = vpop.trf.xlu0 }
 0x1f0   : > { %2280 = vst [vmem:[%s2931_s29 + $0x18] sm:$0xff] %v2136_v56   ;;  %v1313_v59 = vpop.trf.xlu1  ;;  %v1400_v61 = vadd.f32 %v2923_v20, %v1281_v58 }
 0x1f1   : > { %2288 = vst [vmem:[%s2931_s29 + $0x58] sm:$0xff] %v2176_v57   ;;  %v1416_v1 = vadd.f32 %v2923_v20, %v1313_v59 }
 0x1f3   : > { %v1282_v60 = vpop.trf.xlu0 }
 0x1f4   : > { %v1401_v62 = vadd.f32 %v2923_v20, %v1282_v60  ;;  %v1314_v63 = vpop.trf.xlu1 }
 0x1f5   : > { %v1417_v2 = vadd.f32 %v2923_v20, %v1314_v63 }
 0x1f6   : > { %v2141_v3 = vpack.c.bf16 %v1401_v62, %v1400_v61 }
 0x1f7   : > { %v2181_v4 = vpack.c.bf16 %v1417_v2, %v1416_v1  ;;  %v1283_v5 = vpop.trf.xlu0 }
 0x1f8   : > { %2281 = vst [vmem:[%s2931_s29 + $0x20] sm:$0xff] %v2141_v3   ;;  %v1315_v6 = vpop.trf.xlu1  ;;  %v1402_v8 = vadd.f32 %v2923_v20, %v1283_v5 }
 0x1f9   : > { %2289 = vst [vmem:[%s2931_s29 + $0x60] sm:$0xff] %v2181_v4   ;;  %v1418_v11 = vadd.f32 %v2923_v20, %v1315_v6 }
 0x1fb   : > { %v1284_v7 = vpop.trf.xlu0 }
 0x1fc   : > { %v1403_v9 = vadd.f32 %v2923_v20, %v1284_v7  ;;  %v1316_v10 = vpop.trf.xlu1 }
 0x1fd   : > { %v1419_v12 = vadd.f32 %v2923_v20, %v1316_v10 }
 0x1fe   : > { %v2146_v13 = vpack.c.bf16 %v1403_v9, %v1402_v8 }
 0x1ff   : > { %v2186_v14 = vpack.c.bf16 %v1419_v12, %v1418_v11  ;;  %v1285_v15 = vpop.trf.xlu0 }
 0x200   : > { %2282 = vst [vmem:[%s2931_s29 + $0x28] sm:$0xff] %v2146_v13   ;;  %v1317_v16 = vpop.trf.xlu1  ;;  %v1404_v18 = vadd.f32 %v2923_v20, %v1285_v15 }
 0x201   : > { %2290 = vst [vmem:[%s2931_s29 + $0x68] sm:$0xff] %v2186_v14   ;;  %v1420_v22 = vadd.f32 %v2923_v20, %v1317_v16 }
 0x203   : > { %v1286_v17 = vpop.trf.xlu0 }
 0x204   : > { %v1405_v19 = vadd.f32 %v2923_v20, %v1286_v17  ;;  %v1318_v21 = vpop.trf.xlu1 }
 0x205   : > { %v1421_v23 = vadd.f32 %v2923_v20, %v1318_v21 }
 0x206   : > { %v2151_v24 = vpack.c.bf16 %v1405_v19, %v1404_v18 }
 0x207   : > { %v2191_v0 = vpack.c.bf16 %v1421_v23, %v1420_v22  ;;  %v1287_v25 = vpop.trf.xlu0 }
 0x208   : > { %2283 = vst [vmem:[%s2931_s29 + $0x30] sm:$0xff] %v2151_v24   ;;  %v1319_v26 = vpop.trf.xlu1  ;;  %v1406_v28 = vadd.f32 %v2923_v20, %v1287_v25 }
 0x209   : > { %2291 = vst [vmem:[%s2931_s29 + $0x70] sm:$0xff] %v2191_v0   ;;  %v1422_v31 = vadd.f32 %v2923_v20, %v1319_v26 }
 0x20b   : > { %v1288_v27 = vpop.trf.xlu0 }
 0x20c   : > { %v1407_v29 = vadd.f32 %v2923_v20, %v1288_v27  ;;  %v1320_v30 = vpop.trf.xlu1 }
 0x20d   : > { %v1423_v32 = vadd.f32 %v2923_v20, %v1320_v30 }
 0x20e   : > { %v2156_v33 = vpack.c.bf16 %v1407_v29, %v1406_v28 }
 0x20f   : > { %v2196_v34 = vpack.c.bf16 %v1423_v32, %v1422_v31  ;;  %v1337_v35 = vpop.trf.xlu0 }
 0x210   : > { %2284 = vst [vmem:[%s2931_s29 + $0x38] sm:$0xff] %v2156_v33   ;;  %v1369_v36 = vpop.trf.xlu1  ;;  %v1424_v38 = vadd.f32 %v2923_v20, %v1337_v35 }
 0x211   : > { %2292 = vst [vmem:[%s2931_s29 + $0x78] sm:$0xff] %v2196_v34   ;;  %v1440_v41 = vadd.f32 %v2923_v20, %v1369_v36 }
 0x213   : > { %v1338_v37 = vpop.trf.xlu0 }
 0x214   : > { %v1425_v39 = vadd.f32 %v2923_v20, %v1338_v37  ;;  %v1370_v40 = vpop.trf.xlu1 }
 0x215   : > { %v1441_v42 = vadd.f32 %v2923_v20, %v1370_v40 }
 0x216   : > { %v2201_v43 = vpack.c.bf16 %v1425_v39, %v1424_v38 }
 0x217   : > { %v2241_v44 = vpack.c.bf16 %v1441_v42, %v1440_v41  ;;  %v1339_v45 = vpop.trf.xlu0 }
 0x218   : > { %2293 = vst [vmem:[%s2931_s29 + $0x80] sm:$0xff] %v2201_v43   ;;  %v1371_v46 = vpop.trf.xlu1  ;;  %v1426_v48 = vadd.f32 %v2923_v20, %v1339_v45 }
 0x219   : > { %2301 = vst [vmem:[%s2931_s29 + $0xc0] sm:$0xff] %v2241_v44   ;;  %v1442_v51 = vadd.f32 %v2923_v20, %v1371_v46 }
 0x21b   : > { %v1340_v47 = vpop.trf.xlu0 }
 0x21c   : > { %v1427_v49 = vadd.f32 %v2923_v20, %v1340_v47  ;;  %v1372_v50 = vpop.trf.xlu1 }
 0x21d   : > { %v1443_v52 = vadd.f32 %v2923_v20, %v1372_v50 }
 0x21e   : > { %v2206_v53 = vpack.c.bf16 %v1427_v49, %v1426_v48 }
 0x21f   : > { %v2246_v54 = vpack.c.bf16 %v1443_v52, %v1442_v51  ;;  %v1341_v55 = vpop.trf.xlu0 }
 0x220   : > { %2294 = vst [vmem:[%s2931_s29 + $0x88] sm:$0xff] %v2206_v53   ;;  %v1373_v56 = vpop.trf.xlu1  ;;  %v1428_v58 = vadd.f32 %v2923_v20, %v1341_v55 }
 0x221   : > { %2302 = vst [vmem:[%s2931_s29 + $0xc8] sm:$0xff] %v2246_v54   ;;  %v1444_v61 = vadd.f32 %v2923_v20, %v1373_v56 }
 0x223   : > { %v1342_v57 = vpop.trf.xlu0 }
 0x224   : > { %v1429_v59 = vadd.f32 %v2923_v20, %v1342_v57  ;;  %v1374_v60 = vpop.trf.xlu1 }
 0x225   : > { %v1445_v62 = vadd.f32 %v2923_v20, %v1374_v60 }
 0x226   : > { %v2211_v63 = vpack.c.bf16 %v1429_v59, %v1428_v58 }
 0x227   : > { %v2251_v1 = vpack.c.bf16 %v1445_v62, %v1444_v61  ;;  %v1343_v2 = vpop.trf.xlu0 }
 0x228   : > { %2295 = vst [vmem:[%s2931_s29 + $0x90] sm:$0xff] %v2211_v63   ;;  %v1375_v3 = vpop.trf.xlu1  ;;  %v1430_v5 = vadd.f32 %v2923_v20, %v1343_v2 }
 0x229   : > { %2303 = vst [vmem:[%s2931_s29 + $0xd0] sm:$0xff] %v2251_v1   ;;  %v1446_v8 = vadd.f32 %v2923_v20, %v1375_v3 }
 0x22b   : > { %v1344_v4 = vpop.trf.xlu0 }
 0x22c   : > { %v1431_v6 = vadd.f32 %v2923_v20, %v1344_v4  ;;  %v1376_v7 = vpop.trf.xlu1 }
 0x22d   : > { %v1447_v9 = vadd.f32 %v2923_v20, %v1376_v7 }
 0x22e   : > { %v2216_v10 = vpack.c.bf16 %v1431_v6, %v1430_v5 }
 0x22f   : > { %v2256_v11 = vpack.c.bf16 %v1447_v9, %v1446_v8  ;;  %v1345_v12 = vpop.trf.xlu0 }
 0x230   : > { %2296 = vst [vmem:[%s2931_s29 + $0x98] sm:$0xff] %v2216_v10   ;;  %v1377_v13 = vpop.trf.xlu1  ;;  %v1432_v15 = vadd.f32 %v2923_v20, %v1345_v12 }
 0x231   : > { %2304 = vst [vmem:[%s2931_s29 + $0xd8] sm:$0xff] %v2256_v11   ;;  %v1448_v18 = vadd.f32 %v2923_v20, %v1377_v13 }
 0x233   : > { %v1346_v14 = vpop.trf.xlu0 }
 0x234   : > { %v1433_v16 = vadd.f32 %v2923_v20, %v1346_v14  ;;  %v1378_v17 = vpop.trf.xlu1 }
 0x235   : > { %v1449_v19 = vadd.f32 %v2923_v20, %v1378_v17 }
 0x236   : > { %v2221_v21 = vpack.c.bf16 %v1433_v16, %v1432_v15 }
 0x237   : > { %v2261_v22 = vpack.c.bf16 %v1449_v19, %v1448_v18  ;;  %v1347_v23 = vpop.trf.xlu0 }
 0x238   : > { %2297 = vst [vmem:[%s2931_s29 + $0xa0] sm:$0xff] %v2221_v21   ;;  %v1379_v24 = vpop.trf.xlu1  ;;  %v1434_v25 = vadd.f32 %v2923_v20, %v1347_v23 }
 0x239   : > { %2305 = vst [vmem:[%s2931_s29 + $0xe0] sm:$0xff] %v2261_v22   ;;  %v1450_v28 = vadd.f32 %v2923_v20, %v1379_v24 }
 0x23b   : > { %v1348_v0 = vpop.trf.xlu0 }
 0x23c   : > { %v1435_v26 = vadd.f32 %v2923_v20, %v1348_v0  ;;  %v1380_v27 = vpop.trf.xlu1 }
 0x23d   : > { %v1451_v29 = vadd.f32 %v2923_v20, %v1380_v27 }
 0x23e   : > { %v2226_v30 = vpack.c.bf16 %v1435_v26, %v1434_v25 }
 0x23f   : > { %v2266_v31 = vpack.c.bf16 %v1451_v29, %v1450_v28  ;;  %v1349_v32 = vpop.trf.xlu0 }
 0x240   : > { %2298 = vst [vmem:[%s2931_s29 + $0xa8] sm:$0xff] %v2226_v30   ;;  %v1381_v33 = vpop.trf.xlu1  ;;  %v1436_v35 = vadd.f32 %v2923_v20, %v1349_v32 }
 0x241   : > { %2306 = vst [vmem:[%s2931_s29 + $0xe8] sm:$0xff] %v2266_v31   ;;  %v1452_v38 = vadd.f32 %v2923_v20, %v1381_v33 }
 0x243   : > { %v1350_v34 = vpop.trf.xlu0 }
 0x244   : > { %v1437_v36 = vadd.f32 %v2923_v20, %v1350_v34  ;;  %v1382_v37 = vpop.trf.xlu1 }
 0x245   : > { %v1453_v39 = vadd.f32 %v2923_v20, %v1382_v37 }
 0x246   : > { %v2231_v40 = vpack.c.bf16 %v1437_v36, %v1436_v35 }
 0x247   : > { %v2271_v41 = vpack.c.bf16 %v1453_v39, %v1452_v38  ;;  %v1351_v42 = vpop.trf.xlu0 }
 0x248   : > { %2299 = vst [vmem:[%s2931_s29 + $0xb0] sm:$0xff] %v2231_v40   ;;  %v1383_v43 = vpop.trf.xlu1  ;;  %v1438_v45 = vadd.f32 %v2923_v20, %v1351_v42 }
 0x249   : > { %2307 = vst [vmem:[%s2931_s29 + $0xf0] sm:$0xff] %v2271_v41   ;;  %v1454_v48 = vadd.f32 %v2923_v20, %v1383_v43 }
 0x24b   : > { %v1352_v44 = vpop.trf.xlu0  ;;  %1783 = sbr.rel (!%p2693_p4) target bundleno = 619 (0x26b), region = 44 }
 0x24c   : > { %v1439_v46 = vadd.f32 %v2923_v20, %v1352_v44  ;;  %v1384_v47 = vpop.trf.xlu1 }
 0x24d   : > { %v1455_v49 = vadd.f32 %v2923_v20, %v1384_v47 }
 0x24e   : > { %v2236_v50 = vpack.c.bf16 %v1439_v46, %v1438_v45 }
 0x24f   : > { %v2276_v51 = vpack.c.bf16 %v1455_v49, %v1454_v48 }
 0x250   : > { %2300 = vst [vmem:[%s2931_s29 + $0xb8] sm:$0xff] %v2236_v50  }
 0x251   : > { %2308 = vst [vmem:[%s2931_s29 + $0xf8] sm:$0xff] %v2276_v51  }
 0x252   : > { %1789 = vsyncadd %s3027_s7, 896  ;;  %s2373_s8 = smul.u32 3200, %s2609_s21  ;;  %s1796_s9 = sshll.u32 %s2931_s29, 4  ;;  %s3034_s9 = int_to_ptr.vmem [resolvable:$true] %s1796_s9 }
 0x253   : > { %s2543_s13 = scalar_lea.vmem %s3034_s9, 3200  ;;  %s2620_s14 = smov [#allocation2]  }
 0x254   : > { %s1794_s12 = scalar_lea.hbm %s3077_s5, %s2373_s8  ;;  %p2544_p12 = scmp.ne.s32.totalorder %s3034_s9, %s2543_s13 }
 0x255   : > { %s2545_s28 = sshll.u32 %s2620_s14, 4  ;;  %s2546_s28 = int_to_ptr.vmem [resolvable:$false] %s2545_s28 }
 0x256   : > { %s2547_s15 = scalar_lea.vmem %s2546_s28, 8192  ;;  %p2548_p13 = scmp.lt.s32.totalorder %s3034_s9, %s2546_s28 }
 0x257   : > { %p2549_p0 = scmp.lt.s32.totalorder %s2547_s15, %s2543_s13 }
 0x259   : > { %p2550_p1 = por %p2549_p0, %p2548_p13 }
 0x25b   : > { %p2551_p2 = pnand %p2550_p1, %p2544_p12 }
 0x25d   : > { %2554 = shalt.err (!%p2551_p2)
}
 0x25e   : > { %s2555_s21 = scalar_lea.hbm %s1794_s12, 3200  ;;  %s2557_s24 = scalar_lea.hbm %s3077_s5, 6400 }
 0x25f   : > { %p2556_p3 = scmp.ne.s32.totalorder %s1794_s12, %s2555_s21  ;;  %p2558_p4 = scmp.lt.u32.totalorder %s1794_s12, %s3077_s5 }
 0x260   : > { %p2559_p5 = scmp.lt.u32.totalorder %s2557_s24, %s2555_s21  ;;  %p2561_p7 = scmp.lt.u32.totalorder %s2555_s21, %s1794_s12 }
 0x262   : > { %p2560_p6 = por %p2559_p5, %p2558_p4 }
 0x264   : > { %p2562_p9 = por %p2561_p7, %p2560_p6 }
 0x266   : > { %p2563_p10 = pnand %p2562_p9, %p2556_p3 }
 0x268   : > { %2566 = shalt.err (!%p2563_p10)
}
 0x269   : > { %s2621_s29 = smov 64   ;;  %s2622_s8 = smov 4  }
 0x26a   : > { %1802 = dma.vmem_to_hbm [thread:$0]  %s3034_s9, 3200, %s1794_s12, %s3027_s7, %s2621_s29, %s2621_s29, %s2622_s8  }
 0x26b PF: > { %p2379_p11 = scmp.ge.s32.totalorder %s2617_s23, 2  ;;  %s1811_s10 = sand.u32 1, %s2597_s18  }
 0x26c   : > { %s1812_s11 = scalar_lea.sflag [#allocation3], %s1811_s10 }
 0x26d   : > { %p2376_p12 = pnand %p2379_p11, %p2700_p8 }
 0x26f   : > { %2592 = dma.done.wait (!%p2376_p12), %s1812_s11, 4096  }
 0x270   : > { %2594 = vsyncadd (!%p2376_p12), %s1812_s11, 4294963200  ;;  %s18_s23 = sadd.s32 1, %s2617_s23   ;;  %s3080_s18 = smov %s2601_s19 }
 0x271   : > { %p15_p13 = scmp.ge.s32.totalorder %s18_s23, 4   ;;  %s3081_s19 = smov %s2605_s20 }
 0x272   : > { %s3082_s20 = smov %s2706_s6  ;;  %s3083_s21 = smov %s2613_s22 }
 0x273   : > { %s3084_s22 = smov %s3086_s26  ;;  %17 = sbr.rel (!%p15_p13) target bundleno = 4 (0x4), region = 78 }
 0x27a   :  { %1817 = vsyncpa [#allocation3], 1 }
 0x27b   :  { %1819 = vsyncpa [#allocation3 + $0x1], 1 }

</bundles_post_ra>
